<compile_context>
chip_gen: v5e
topology: v5e:2x2
jax: 0.10.0
libtpu: 0.0.40
codegen_flags: <defaults>
</compile_context>

<pallas_src>
import functools

import jax
import jax.numpy as jnp
import numpy as np
from jax.experimental import pallas as pl
from jax.experimental.pallas import tpu as pltpu


# ----------------------------------------------------------------------------
# Kernel 1: folded transposed conv (kernel_size == stride == r), channels-first.
# For each input voxel all r^3*Cout outputs are W1fold[(kd,kh,kw,co), ci] @ x[ci, s_in],
# i.e. one matmul with lanes = input voxels and a small resident (K3*Cout, Cin) weight.
# ----------------------------------------------------------------------------
def upconv_kernel(x_ref, w_ref, o_ref):
    o_ref[0] = jnp.dot(
        w_ref[...], x_ref[0], preferred_element_type=jnp.float32
    ).astype(o_ref.dtype)


# ----------------------------------------------------------------------------
# Kernel 2: fused  z = up + W2b^T @ feat + b_fold  plus masked per-tile GroupNorm
# partials (tile sum and tile M2 about the tile mean, for Chan's combine outside).
# ----------------------------------------------------------------------------
def fuse_feat_stats_kernel(up_ref, feat_ref, w_ref, b_ref,
                           z_ref, psum_ref, pm2_ref, *, s_total):
    cout = z_ref.shape[-2]
    ts = z_ref.shape[-1]
    z = (up_ref[0].astype(jnp.float32)
         + jnp.dot(w_ref[...], feat_ref[0], preferred_element_type=jnp.float32)
         + b_ref[...])
    z_ref[0] = z.astype(z_ref.dtype)

    # Mask off the out-of-range lanes of a boundary tile (cdiv grid).
    lane = jax.lax.broadcasted_iota(jnp.int32, (1, ts), 1)
    valid = (pl.program_id(1) * ts + lane) < s_total                 # (1, ts)
    nvalid = jnp.sum(valid.astype(jnp.float32)) * cout
    zm = jnp.where(valid, z, 0.0)
    tsum = jnp.sum(zm)
    tmean = tsum / nvalid
    tm2 = jnp.sum(jnp.where(valid, (z - tmean) * (z - tmean), 0.0))
    psum_ref[...] = jnp.broadcast_to(tsum, psum_ref.shape)
    pm2_ref[...] = jnp.broadcast_to(tm2, pm2_ref.shape)


# ----------------------------------------------------------------------------
# Kernel 3: apply per-sample, per-channel GroupNorm affine (lane-dense elementwise):
#   out = z * scale[n, c] + shift[n, c]
# ----------------------------------------------------------------------------
def norm_kernel(z_ref, scale_ref, shift_ref, o_ref):
    o_ref[0] = (z_ref[0] * scale_ref[0] + shift_ref[0]).astype(o_ref.dtype)


def _pick_tile(total, target, align=128):
    """Lane tile: largest `align`-multiple divisor of `total` that is <= target.
    If none exists, return an align-multiple <= target (the grid then uses cdiv and
    the boundary tile is masked / its OOB writes dropped) -- never the whole dim."""
    if total <= target:
        return total                       # full dim is always a legal block shape
    t = max(align, (target // align) * align)
    for cand in range(t, align - 1, -align):
        if total % cand == 0:
            return cand
    return t


def _lane_cap(bytes_per_lane, budget=10 << 20, cap=1 << 15):
    """Largest 128-multiple lane tile whose double-buffered VMEM stays under `budget`."""
    t = budget // max(1, bytes_per_lane)
    return int(max(128, min(cap, (t // 128) * 128)))


# ----------------------------------------------------------------------------
# Wrapper: weight folding + three pallas_calls.  All layout changes except one
# (kd,kh,kw)->spatial interleave (a single bf16 XLA transpose) are free reshapes.
# ----------------------------------------------------------------------------
@functools.partial(jax.jit,
                   static_argnames=("r", "eps", "ts_in_target", "ts_out_target"))
def transposed_conv_layer(x, feature, W1, b1, W2, b2, gamma, beta, *, r,
                          eps=1e-5, ts_in_target=8192, ts_out_target=16384):
    N, Cin, Din, Hin, Win = x.shape
    Cout = W1.shape[1]
    Dout, Hout, Wout = Din * r, Hin * r, Win * r
    Sin, Sout, K3 = Din * Hin * Win, Dout * Hout * Wout, r * r * r
    f32 = jnp.float32

    # ---- fold the 1x1x1 conv (up half) + biases into the transposed conv (tiny) ----
    hi = jax.lax.Precision.HIGHEST
    W2f = W2[:, :, 0, 0, 0]                                   # (2*Cout, Cout)
    W2a, W2b = W2f[:Cout], W2f[Cout:]
    Wk = jnp.einsum("iokpq,oc->kpqci", W1, W2a,
                    precision=hi).reshape(K3 * Cout, Cin)     # rows = (kd,kh,kw,co)
    b_fold = (b2 + jnp.einsum("o,oc->c", b1, W2a, precision=hi)).reshape(Cout, 1)
    W2bT = W2b.T                                              # (Cout, Cout_feat)

    # ---- stage 1: folded upsample matmul, channels-first, bf16 intermediate ----
    x_cf = x.reshape(N, Cin, Sin)                             # free reshape
    ts1_cap = _lane_cap(2 * (4 * Cin + 2 * K3 * Cout))        # x f32 + h1 bf16, double-buffered
    ts1 = _pick_tile(Sin, min(ts_in_target, ts1_cap))
    g1 = (Sin + ts1 - 1) // ts1
    h1 = pl.pallas_call(
        upconv_kernel,
        out_shape=jax.ShapeDtypeStruct((N, K3 * Cout, Sin), jnp.bfloat16),
        grid=(N, g1),
        in_specs=[
            pl.BlockSpec((1, Cin, ts1), lambda n, s: (n, 0, s)),
            pl.BlockSpec((K3 * Cout, Cin), lambda n, s: (0, 0)),   # resident weight
        ],
        out_specs=pl.BlockSpec((1, K3 * Cout, ts1), lambda n, s: (n, 0, s)),
        compiler_params=pltpu.CompilerParams(
            dimension_semantics=("parallel", "parallel")),
    )(x_cf, Wk)

    # The single remaining O(N*Cout*Sout) relayout, done by XLA on bf16 (half traffic).
    # TODO(synk): move in-kernel (strided lane stores) to drop this HBM round trip.
    up_cf = (h1.reshape(N, r, r, r, Cout, Din, Hin, Win)
               .transpose(0, 4, 5, 1, 6, 2, 7, 3)
               .reshape(N, Cout, Sout))

    feat_cf = feature.reshape(N, Cout, Sout)                  # free reshape

    # ---- stage 2a: add feature path + bias, emit masked per-tile GN partials ----
    ts2_cap = _lane_cap(2 * (2 * Cout + 4 * Cout + 4 * Cout)) # up bf16 + feat f32 + z f32
    ts2 = _pick_tile(Sout, min(ts_out_target, ts2_cap))
    nt2 = (Sout + ts2 - 1) // ts2
    z, psum, pm2 = pl.pallas_call(
        functools.partial(fuse_feat_stats_kernel, s_total=Sout),
        out_shape=[
            jax.ShapeDtypeStruct((N, Cout, Sout), f32),
            jax.ShapeDtypeStruct((N, nt2, 8, 128), f32),
            jax.ShapeDtypeStruct((N, nt2, 8, 128), f32),
        ],
        grid=(N, nt2),
        in_specs=[
            pl.BlockSpec((1, Cout, ts2), lambda n, s: (n, 0, s)),
            pl.BlockSpec((1, Cout, ts2), lambda n, s: (n, 0, s)),
            pl.BlockSpec((Cout, Cout), lambda n, s: (0, 0)),
            pl.BlockSpec((Cout, 1), lambda n, s: (0, 0)),
        ],
        out_specs=[
            pl.BlockSpec((1, Cout, ts2), lambda n, s: (n, 0, s)),
            pl.BlockSpec((1, 1, 8, 128), lambda n, s: (n, s, 0, 0)),
            pl.BlockSpec((1, 1, 8, 128), lambda n, s: (n, s, 0, 0)),
        ],
        compiler_params=pltpu.CompilerParams(
            dimension_semantics=("parallel", "parallel")),
    )(up_cf, feat_cf, W2bT, b_fold)

    # ---- stage 2b: finalize GroupNorm(groups=1) stats with Chan's parallel combine ----
    counts = np.minimum(ts2, Sout - ts2 * np.arange(nt2)) * Cout      # static per-tile counts
    counts = jnp.asarray(counts, f32)                                 # (nt2,)
    sums = psum[:, :, 0, 0]                                           # (N, nt2)
    m2s = pm2[:, :, 0, 0]
    total = float(Cout * Sout)
    tile_means = sums / counts[None, :]
    mean = jnp.sum(sums, axis=1) / total                              # (N,)
    M2 = (jnp.sum(m2s, axis=1)
          + jnp.sum(counts[None, :] * (tile_means - mean[:, None]) ** 2, axis=1))
    var = M2 / total                                                  # biased var (PyTorch GN)
    inv = jax.lax.rsqrt(var + eps)
    scale = (inv[:, None] * gamma[None, :]).reshape(N, Cout, 1)
    shift = (beta[None, :] - mean[:, None] * inv[:, None] * gamma[None, :]).reshape(N, Cout, 1)

    # ---- stage 2c: lane-dense normalize; z is aliased into the output buffer ----
    out_cf = pl.pallas_call(
        norm_kernel,
        out_shape=jax.ShapeDtypeStruct((N, Cout, Sout), f32),
        grid=(N, nt2),
        in_specs=[
            pl.BlockSpec((1, Cout, ts2), lambda n, s: (n, 0, s)),
            pl.BlockSpec((1, Cout, 1), lambda n, s: (n, 0, 0)),
            pl.BlockSpec((1, Cout, 1), lambda n, s: (n, 0, 0)),
        ],
        out_specs=pl.BlockSpec((1, Cout, ts2), lambda n, s: (n, 0, s)),
        input_output_aliases={0: 0},
        compiler_params=pltpu.CompilerParams(
            dimension_semantics=("parallel", "parallel")),
    )(z, scale, shift)

    return out_cf.reshape(N, Cout, Dout, Hout, Wout)


# ----------------------------------------------------------------------------
# Pure-JAX reference (direct PyTorch-semantics math) for verification.
# ----------------------------------------------------------------------------
def reference(x, feat, W1, b1, W2, b2, gamma, beta, r, eps=1e-5):
    N, Cin, D, H, W = x.shape
    Cout = W1.shape[1]
    hi = jax.lax.Precision.HIGHEST
    # ConvTranspose3d with kernel_size == stride == r
    y = jnp.einsum("nidhw,iokpq->nodkhpwq", x, W1, precision=hi)
    y = y.reshape(N, Cout, D * r, H * r, W * r) + b1[None, :, None, None, None]
    cat = jnp.concatenate([y, feat], axis=1)
    W2f = W2[:, :, 0, 0, 0]
    z = jnp.einsum("ncdhw,co->nodhw", cat, W2f, precision=hi) + b2[None, :, None, None, None]
    mean = jnp.mean(z, axis=(1, 2, 3, 4), keepdims=True)
    var = jnp.mean((z - mean) ** 2, axis=(1, 2, 3, 4), keepdims=True)
    zn = (z - mean) * jax.lax.rsqrt(var + eps)
    return zn * gamma[None, :, None, None, None] + beta[None, :, None, None, None]


def _run_case(N, dim_in, dim_out, r, Din, Hin, Win, ts_in_target, ts_out_target):
    key = jax.random.PRNGKey(0)
    ks = jax.random.split(key, 8)
    Dout, Hout, Wout = Din * r, Hin * r, Win * r
    x = jax.random.normal(ks[0], (N, dim_in, Din, Hin, Win), jnp.float32)
    feature = jax.random.normal(ks[1], (N, dim_out, Dout, Hout, Wout), jnp.float32)
    W1 = jax.random.normal(ks[2], (dim_in, dim_out, r, r, r), jnp.float32) * 0.1
    b1 = jax.random.normal(ks[3], (dim_out,), jnp.float32) * 0.1
    W2 = jax.random.normal(ks[4], (2 * dim_out, dim_out, 1, 1, 1), jnp.float32) * 0.1
    b2 = jax.random.normal(ks[5], (dim_out,), jnp.float32) * 0.1
    gamma = 1.0 + 0.1 * jax.random.normal(ks[6], (dim_out,), jnp.float32)
    beta = 0.1 * jax.random.normal(ks[7], (dim_out,), jnp.float32)

    out = transposed_conv_layer(x, feature, W1, b1, W2, b2, gamma, beta, r=r,
                                ts_in_target=ts_in_target, ts_out_target=ts_out_target)
    out = jax.block_until_ready(out)
    ref = jax.block_until_ready(reference(x, feature, W1, b1, W2, b2, gamma, beta, r))
    # tolerance accounts for the bf16 upsample intermediate (deliberate perf choice)
    np.testing.assert_allclose(np.asarray(out), np.asarray(ref), rtol=2e-2, atol=2e-2)


if __name__ == "__main__":
    # Small, module-consistent shapes (tiles == full spatial dim, all-true masks).
    _run_case(N=2, dim_in=32, dim_out=16, r=2, Din=4, Hin=4, Win=4,
              ts_in_target=8192, ts_out_target=16384)
    # Ragged shapes with forced small tiles: exercises cdiv grids + masked boundary stats.
    _run_case(N=1, dim_in=20, dim_out=12, r=3, Din=4, Hin=6, Win=6,
              ts_in_target=128, ts_out_target=128)
    print("KERNEL_OK")
</pallas_src>

<mosaic_0001>
module attributes {stable_mosaic.version = 11 : i64} {
  func.func @upconv_kernel(%arg0: i32, %arg1: i32, %arg2: memref<1x32x64xf32, #tpu.memory_space<vmem>>, %arg3: memref<128x32xf32, #tpu.memory_space<vmem>>, %arg4: memref<1x128x64xbf16, #tpu.memory_space<vmem>>) attributes {dimension_semantics = [#tpu.dimension_semantics<parallel>, #tpu.dimension_semantics<parallel>], iteration_bounds = array<i64: 2, 1>, scalar_prefetch = 0 : i64, scratch_operands = 0 : i64, tpu.core_type = #tpu.core_type<tc>, window_params = [{transform_indices = @transform_0, window_bounds = array<i64: 1, 32, 64>}, {pipeline_mode = #tpu.pipeline_mode<synchronous>, transform_indices = @transform_1, window_bounds = array<i64: 128, 32>}, {transform_indices = @transform_2, window_bounds = array<i64: 1, 128, 64>}]} {
    %c0 = arith.constant 0 : index
    %c0_0 = arith.constant 0 : index
    %0 = vector.load %arg3[%c0, %c0_0] : memref<128x32xf32, #tpu.memory_space<vmem>>, vector<128x32xf32>
    %c0_1 = arith.constant 0 : index
    %c0_2 = arith.constant 0 : index
    %c0_3 = arith.constant 0 : index
    %1 = vector.load %arg2[%c0_1, %c0_2, %c0_3] : memref<1x32x64xf32, #tpu.memory_space<vmem>>, vector<1x32x64xf32>
    %2 = vector.shape_cast %1 : vector<1x32x64xf32> to vector<32x64xf32>
    %cst = arith.constant dense<0.000000e+00> : vector<128x64xf32>
    %3 = tpu.matmul %0, %2, %cst {dimension_numbers = #tpu.dot_dimension_numbers<[1], [0], [0], [1], [0, 0, 1, 1], [], []>} : vector<128x32xf32>, vector<32x64xf32>, vector<128x64xf32> -> vector<128x64xf32>
    %4 = arith.truncf %3 : vector<128x64xf32> to vector<128x64xbf16>
    %c0_4 = arith.constant 0 : index
    %c0_5 = arith.constant 0 : index
    %c0_6 = arith.constant 0 : index
    %5 = vector.load %arg4[%c0_4, %c0_5, %c0_6] : memref<1x128x64xbf16, #tpu.memory_space<vmem>>, vector<1x128x64xbf16>
    %6 = vector.shape_cast %5 : vector<1x128x64xbf16> to vector<128x64xbf16>
    %7 = vector.shape_cast %4 : vector<128x64xbf16> to vector<1x128x64xbf16>
    tpu.vector_store %arg4[%c0_4, %c0_5, %c0_6], %7 {strides = array<i32>} : memref<1x128x64xbf16, #tpu.memory_space<vmem>>, vector<1x128x64xbf16>,
    return
  }
  func.func @transform_0(%arg0: i32, %arg1: i32) -> (i32, i32, i32) {
    %c0_i32 = arith.constant 0 : i32
    %c0_i32_0 = arith.constant 0 : i32
    return %arg0, %c0_i32, %arg1 : i32, i32, i32
  }
  func.func @transform_1(%arg0: i32, %arg1: i32) -> (i32, i32) {
    %c0_i32 = arith.constant 0 : i32
    %c0_i32_0 = arith.constant 0 : i32
    %c0_i32_1 = arith.constant 0 : i32
    return %c0_i32, %c0_i32_0 : i32, i32
  }
  func.func @transform_2(%arg0: i32, %arg1: i32) -> (i32, i32, i32) {
    %c0_i32 = arith.constant 0 : i32
    %c0_i32_0 = arith.constant 0 : i32
    return %arg0, %c0_i32, %arg1 : i32, i32, i32
  }
}

module attributes {stable_mosaic.version = 11 : i64} {
  func.func @fuse_feat_stats_kernel(%arg0: i32, %arg1: i32, %arg2: memref<1x16x512xbf16, #tpu.memory_space<vmem>>, %arg3: memref<1x16x512xf32, #tpu.memory_space<vmem>>, %arg4: memref<16x16xf32, #tpu.memory_space<vmem>>, %arg5: memref<16x1xf32, #tpu.memory_space<vmem>>, %arg6: memref<1x16x512xf32, #tpu.memory_space<vmem>>, %arg7: memref<1x1x8x128xf32, #tpu.memory_space<vmem>>, %arg8: memref<1x1x8x128xf32, #tpu.memory_space<vmem>>) attributes {dimension_semantics = [#tpu.dimension_semantics<parallel>, #tpu.dimension_semantics<parallel>], iteration_bounds = array<i64: 2, 1>, scalar_prefetch = 0 : i64, scratch_operands = 0 : i64, tpu.core_type = #tpu.core_type<tc>, window_params = [{transform_indices = @transform_0, window_bounds = array<i64: 1, 16, 512>}, {transform_indices = @transform_1, window_bounds = array<i64: 1, 16, 512>}, {pipeline_mode = #tpu.pipeline_mode<synchronous>, transform_indices = @transform_2, window_bounds = array<i64: 16, 16>}, {pipeline_mode = #tpu.pipeline_mode<synchronous>, transform_indices = @transform_3, window_bounds = array<i64: 16, 1>}, {transform_indices = @transform_4, window_bounds = array<i64: 1, 16, 512>}, {transform_indices = @transform_5, window_bounds = array<i64: 1, 1, 8, 128>}, {transform_indices = @transform_6, window_bounds = array<i64: 1, 1, 8, 128>}]} {
    %c0 = arith.constant 0 : index
    %c0_0 = arith.constant 0 : index
    %c0_1 = arith.constant 0 : index
    %0 = vector.load %arg2[%c0, %c0_0, %c0_1] : memref<1x16x512xbf16, #tpu.memory_space<vmem>>, vector<1x16x512xbf16>
    %1 = vector.shape_cast %0 : vector<1x16x512xbf16> to vector<16x512xbf16>
    %2 = arith.extf %1 : vector<16x512xbf16> to vector<16x512xf32>
    %c0_2 = arith.constant 0 : index
    %c0_3 = arith.constant 0 : index
    %3 = vector.load %arg4[%c0_2, %c0_3] : memref<16x16xf32, #tpu.memory_space<vmem>>, vector<16x16xf32>
    %c0_4 = arith.constant 0 : index
    %c0_5 = arith.constant 0 : index
    %c0_6 = arith.constant 0 : index
    %4 = vector.load %arg3[%c0_4, %c0_5, %c0_6] : memref<1x16x512xf32, #tpu.memory_space<vmem>>, vector<1x16x512xf32>
    %5 = vector.shape_cast %4 : vector<1x16x512xf32> to vector<16x512xf32>
    %cst = arith.constant dense<0.000000e+00> : vector<16x512xf32>
    %6 = tpu.matmul %3, %5, %cst {dimension_numbers = #tpu.dot_dimension_numbers<[1], [0], [0], [1], [0, 0, 1, 1], [], []>} : vector<16x16xf32>, vector<16x512xf32>, vector<16x512xf32> -> vector<16x512xf32>
    %7 = arith.addf %2, %6 : vector<16x512xf32>
    %c0_7 = arith.constant 0 : index
    %c0_8 = arith.constant 0 : index
    %8 = vector.load %arg5[%c0_7, %c0_8] : memref<16x1xf32, #tpu.memory_space<vmem>>, vector<16x1xf32>
    %9 = vector.broadcast %8 : vector<16x1xf32> to vector<16x512xf32>
    %10 = arith.addf %7, %9 : vector<16x512xf32>
    %c0_9 = arith.constant 0 : index
    %c0_10 = arith.constant 0 : index
    %c0_11 = arith.constant 0 : index
    %11 = vector.load %arg6[%c0_9, %c0_10, %c0_11] : memref<1x16x512xf32, #tpu.memory_space<vmem>>, vector<1x16x512xf32>
    %12 = vector.shape_cast %11 : vector<1x16x512xf32> to vector<16x512xf32>
    %13 = vector.shape_cast %10 : vector<16x512xf32> to vector<1x16x512xf32>
    tpu.vector_store %arg6[%c0_9, %c0_10, %c0_11], %13 {strides = array<i32>} : memref<1x16x512xf32, #tpu.memory_space<vmem>>, vector<1x16x512xf32>,
    %14 = tpu.iota {dimensions = array<i32: 1>} : vector<1x512xi32>
    %c512_i32 = arith.constant 512 : i32
    %15 = arith.muli %arg1, %c512_i32 : i32
    %16 = vector.broadcast %15 : i32 to vector<1x512xi32>
    %17 = arith.addi %16, %14 : vector<1x512xi32>
    %c512_i32_12 = arith.constant 512 : i32
    %18 = vector.broadcast %c512_i32_12 : i32 to vector<1x512xi32>
    %19 = arith.cmpi slt, %17, %18 : vector<1x512xi32>
    %20 = arith.extui %19 : vector<1x512xi1> to vector<1x512xi32>
    %21 = arith.sitofp %20 : vector<1x512xi32> to vector<1x512xf32>
    %22 = vector.shape_cast %21 : vector<1x512xf32> to vector<1x1x512xf32>
    %cst_13 = arith.constant dense<0.000000e+00> : vector<1xf32>
    %23 = vector.multi_reduction <add>, %22, %cst_13 [1, 2] : vector<1x1x512xf32> to vector<1xf32>
    %24 = vector.shape_cast %23 : vector<1xf32> to vector<1x1x1xf32>
    %25 = vector.extract %24[0, 0, 0] : f32 from vector<1x1x1xf32>
    %cst_14 = arith.constant 1.600000e+01 : f32
    %26 = arith.mulf %25, %cst_14 : f32
    %cst_15 = arith.constant 0.000000e+00 : f32
    %27 = vector.shape_cast %19 : vector<1x512xi1> to vector<1x512xi1>
    %28 = vector.broadcast %27 : vector<1x512xi1> to vector<16x512xi1>
    %29 = vector.broadcast %cst_15 : f32 to vector<16x512xf32>
    %30 = arith.select %28, %10, %29 : vector<16x512xi1>, vector<16x512xf32>
    %31 = vector.shape_cast %30 : vector<16x512xf32> to vector<1x16x512xf32>
    %cst_16 = arith.constant dense<0.000000e+00> : vector<1xf32>
    %32 = vector.multi_reduction <add>, %31, %cst_16 [1, 2] : vector<1x16x512xf32> to vector<1xf32>
    %33 = vector.shape_cast %32 : vector<1xf32> to vector<1x1x1xf32>
    %34 = vector.extract %33[0, 0, 0] : f32 from vector<1x1x1xf32>
    %35 = arith.divf %34, %26 : f32
    %36 = vector.broadcast %35 : f32 to vector<16x512xf32>
    %37 = arith.subf %10, %36 : vector<16x512xf32>
    %38 = vector.broadcast %35 : f32 to vector<16x512xf32>
    %39 = arith.subf %10, %38 : vector<16x512xf32>
    %40 = arith.mulf %37, %39 : vector<16x512xf32>
    %cst_17 = arith.constant 0.000000e+00 : f32
    %41 = vector.shape_cast %19 : vector<1x512xi1> to vector<1x512xi1>
    %42 = vector.broadcast %41 : vector<1x512xi1> to vector<16x512xi1>
    %43 = vector.broadcast %cst_17 : f32 to vector<16x512xf32>
    %44 = arith.select %42, %40, %43 : vector<16x512xi1>, vector<16x512xf32>
    %45 = vector.shape_cast %44 : vector<16x512xf32> to vector<1x16x512xf32>
    %cst_18 = arith.constant dense<0.000000e+00> : vector<1xf32>
    %46 = vector.multi_reduction <add>, %45, %cst_18 [1, 2] : vector<1x16x512xf32> to vector<1xf32>
    %47 = vector.shape_cast %46 : vector<1xf32> to vector<1x1x1xf32>
    %48 = vector.extract %47[0, 0, 0] : f32 from vector<1x1x1xf32>
    %49 = vector.broadcast %34 : f32 to vector<1x1x8x128xf32>
    %c0_19 = arith.constant 0 : index
    %c0_20 = arith.constant 0 : index
    %c0_21 = arith.constant 0 : index
    %c0_22 = arith.constant 0 : index
    %50 = vector.load %arg7[%c0_19, %c0_20, %c0_21, %c0_22] : memref<1x1x8x128xf32, #tpu.memory_space<vmem>>, vector<1x1x8x128xf32>
    tpu.vector_store %arg7[%c0_19, %c0_20, %c0_21, %c0_22], %49 {strides = array<i32>} : memref<1x1x8x128xf32, #tpu.memory_space<vmem>>, vector<1x1x8x128xf32>,
    %51 = vector.broadcast %48 : f32 to vector<1x1x8x128xf32>
    %c0_23 = arith.constant 0 : index
    %c0_24 = arith.constant 0 : index
    %c0_25 = arith.constant 0 : index
    %c0_26 = arith.constant 0 : index
    %52 = vector.load %arg8[%c0_23, %c0_24, %c0_25, %c0_26] : memref<1x1x8x128xf32, #tpu.memory_space<vmem>>, vector<1x1x8x128xf32>
    tpu.vector_store %arg8[%c0_23, %c0_24, %c0_25, %c0_26], %51 {strides = array<i32>} : memref<1x1x8x128xf32, #tpu.memory_space<vmem>>, vector<1x1x8x128xf32>,
    return
  }
  func.func @transform_0(%arg0: i32, %arg1: i32) -> (i32, i32, i32) {
    %c0_i32 = arith.constant 0 : i32
    %c0_i32_0 = arith.constant 0 : i32
    return %arg0, %c0_i32, %arg1 : i32, i32, i32
  }
  func.func @transform_1(%arg0: i32, %arg1: i32) -> (i32, i32, i32) {
    %c0_i32 = arith.constant 0 : i32
    %c0_i32_0 = arith.constant 0 : i32
    return %arg0, %c0_i32, %arg1 : i32, i32, i32
  }
  func.func @transform_2(%arg0: i32, %arg1: i32) -> (i32, i32) {
    %c0_i32 = arith.constant 0 : i32
    %c0_i32_0 = arith.constant 0 : i32
    %c0_i32_1 = arith.constant 0 : i32
    return %c0_i32, %c0_i32_0 : i32, i32
  }
  func.func @transform_3(%arg0: i32, %arg1: i32) -> (i32, i32) {
    %c0_i32 = arith.constant 0 : i32
    %c0_i32_0 = arith.constant 0 : i32
    %c0_i32_1 = arith.constant 0 : i32
    return %c0_i32, %c0_i32_0 : i32, i32
  }
  func.func @transform_4(%arg0: i32, %arg1: i32) -> (i32, i32, i32) {
    %c0_i32 = arith.constant 0 : i32
    %c0_i32_0 = arith.constant 0 : i32
    return %arg0, %c0_i32, %arg1 : i32, i32, i32
  }
  func.func @transform_5(%arg0: i32, %arg1: i32) -> (i32, i32, i32, i32) {
    %c0_i32 = arith.constant 0 : i32
    %c0_i32_0 = arith.constant 0 : i32
    %c0_i32_1 = arith.constant 0 : i32
    return %arg0, %arg1, %c0_i32, %c0_i32_0 : i32, i32, i32, i32
  }
  func.func @transform_6(%arg0: i32, %arg1: i32) -> (i32, i32, i32, i32) {
    %c0_i32 = arith.constant 0 : i32
    %c0_i32_0 = arith.constant 0 : i32
    %c0_i32_1 = arith.constant 0 : i32
    return %arg0, %arg1, %c0_i32, %c0_i32_0 : i32, i32, i32, i32
  }
}

module attributes {stable_mosaic.version = 11 : i64} {
  func.func @norm_kernel(%arg0: i32, %arg1: i32, %arg2: memref<1x16x512xf32, #tpu.memory_space<vmem>>, %arg3: memref<1x16x1xf32, #tpu.memory_space<vmem>>, %arg4: memref<1x16x1xf32, #tpu.memory_space<vmem>>, %arg5: memref<1x16x512xf32, #tpu.memory_space<vmem>>) attributes {dimension_semantics = [#tpu.dimension_semantics<parallel>, #tpu.dimension_semantics<parallel>], iteration_bounds = array<i64: 2, 1>, scalar_prefetch = 0 : i64, scratch_operands = 0 : i64, tpu.core_type = #tpu.core_type<tc>, window_params = [{transform_indices = @transform_0, window_bounds = array<i64: 1, 16, 512>}, {transform_indices = @transform_1, window_bounds = array<i64: 1, 16, 1>}, {transform_indices = @transform_2, window_bounds = array<i64: 1, 16, 1>}, {transform_indices = @transform_3, window_bounds = array<i64: 1, 16, 512>}]} {
    %c0 = arith.constant 0 : index
    %c0_0 = arith.constant 0 : index
    %c0_1 = arith.constant 0 : index
    %0 = vector.load %arg2[%c0, %c0_0, %c0_1] : memref<1x16x512xf32, #tpu.memory_space<vmem>>, vector<1x16x512xf32>
    %1 = vector.shape_cast %0 : vector<1x16x512xf32> to vector<16x512xf32>
    %c0_2 = arith.constant 0 : index
    %c0_3 = arith.constant 0 : index
    %c0_4 = arith.constant 0 : index
    %2 = vector.load %arg3[%c0_2, %c0_3, %c0_4] : memref<1x16x1xf32, #tpu.memory_space<vmem>>, vector<1x16x1xf32>
    %3 = vector.shape_cast %2 : vector<1x16x1xf32> to vector<16x1xf32>
    %4 = vector.broadcast %3 : vector<16x1xf32> to vector<16x512xf32>
    %5 = arith.mulf %1, %4 : vector<16x512xf32>
    %c0_5 = arith.constant 0 : index
    %c0_6 = arith.constant 0 : index
    %c0_7 = arith.constant 0 : index
    %6 = vector.load %arg4[%c0_5, %c0_6, %c0_7] : memref<1x16x1xf32, #tpu.memory_space<vmem>>, vector<1x16x1xf32>
    %7 = vector.shape_cast %6 : vector<1x16x1xf32> to vector<16x1xf32>
    %8 = vector.broadcast %7 : vector<16x1xf32> to vector<16x512xf32>
    %9 = arith.addf %5, %8 : vector<16x512xf32>
    %c0_8 = arith.constant 0 : index
    %c0_9 = arith.constant 0 : index
    %c0_10 = arith.constant 0 : index
    %10 = vector.load %arg5[%c0_8, %c0_9, %c0_10] : memref<1x16x512xf32, #tpu.memory_space<vmem>>, vector<1x16x512xf32>
    %11 = vector.shape_cast %10 : vector<1x16x512xf32> to vector<16x512xf32>
    %12 = vector.shape_cast %9 : vector<16x512xf32> to vector<1x16x512xf32>
    tpu.vector_store %arg5[%c0_8, %c0_9, %c0_10], %12 {strides = array<i32>} : memref<1x16x512xf32, #tpu.memory_space<vmem>>, vector<1x16x512xf32>,
    return
  }
  func.func @transform_0(%arg0: i32, %arg1: i32) -> (i32, i32, i32) {
    %c0_i32 = arith.constant 0 : i32
    %c0_i32_0 = arith.constant 0 : i32
    return %arg0, %c0_i32, %arg1 : i32, i32, i32
  }
  func.func @transform_1(%arg0: i32, %arg1: i32) -> (i32, i32, i32) {
    %c0_i32 = arith.constant 0 : i32
    %c0_i32_0 = arith.constant 0 : i32
    %c0_i32_1 = arith.constant 0 : i32
    return %arg0, %c0_i32, %c0_i32_0 : i32, i32, i32
  }
  func.func @transform_2(%arg0: i32, %arg1: i32) -> (i32, i32, i32) {
    %c0_i32 = arith.constant 0 : i32
    %c0_i32_0 = arith.constant 0 : i32
    %c0_i32_1 = arith.constant 0 : i32
    return %arg0, %c0_i32, %c0_i32_0 : i32, i32, i32
  }
  func.func @transform_3(%arg0: i32, %arg1: i32) -> (i32, i32, i32) {
    %c0_i32 = arith.constant 0 : i32
    %c0_i32_0 = arith.constant 0 : i32
    return %arg0, %c0_i32, %arg1 : i32, i32, i32
  }
}

</mosaic_0001>

<bundles_post_ra>
// kernel: transposed_conv_layer.3
= control target key start
LH: loop header
LB: loop body
LE: loop exit
PB: predicated region body
PF: predicated region fallthrough
CT: control target
= control target key end

     0   :  { %s529_s9 = smov 0   ;;  %s531_s10 = smov 0   ;;  %s664_s0 = inlined_call_operand.vmem [shape: f32[2,32,64], index: 0, kind: input, shape index: {}]   ;;  %s665_s1 = inlined_call_operand.vmem [shape: f32[128,32], index: 1, kind: input, shape index: {}]   ;;  %s666_s2 = inlined_call_operand.vmem [shape: bf16[2,128,64], index: 2, kind: output, shape index: {}]  }
   0x1   :  { %s533_s11 = smov 0  }
   0x2 LB: > { %s24_s12 = sadd.s32 1, %s508_s10  ;;  %p429_p0 = scmp.ge.s32.totalorder %s512_s11, 1  ;;  %s512_s11 = sphi %s533_s11, %s12_s11   ;;  %s508_s10 = sphi %s531_s10, %s668_s10   ;;  %s504_s9 = sphi %s529_s9, %s667_s9  }
   0x3   : > { %p26_p1 = scmp.ge.s32.totalorder %s24_s12, 2  ;;  %p131_p2 = scmp.lt.s32.totalorder %s512_s11, 3 }
   0x5   : > { %s670_s12 = smov (%p26_p1, %s24_s12), 0  ;;  %p132_p3 = pnand %p429_p0, %p131_p2 }
   0x6   : > { %p159_p4 = scmp.lt.s32.totalorder (!%p132_p3), %s504_s9, 1 }
   0x7   : > { %135 = sbr.rel (%p132_p3) target bundleno = 183 (0xb7), region = 28 }
   0xc   : > { %s672_s9 = smov (!%p159_p4, %s504_s9), 1  ;;  %v183_v4 = vld [vmem:[%s665_s1 + $0x40] sm:$0xff]  ;;  %vm195_vm0 = vcmask 261120   ;;  %v184_v8 = vld [vmem:[%s665_s1 + $0x48] sm:$0xff]  ;;  %v185_v12 = vld [vmem:[%s665_s1 + $0x50] sm:$0xff]  ;;  %vm325_vm1 = vcmask 519168  }
   0xd   : > { %s452_s13 = sshll.u32 %s672_s9, 5  ;;  %v187_v5 = vld [vmem:[%s665_s1 + $0x60] sm:$0xff]  ;;  %v188_v9 = vld [vmem:[%s665_s1 + $0x68] sm:$0xff]  ;;  %v189_v13 = vld [vmem:[%s665_s1 + $0x70] sm:$0xff]  ;;  %s453_s25 = sshll.u32 %s672_s9, 6 }
   0xe   : > { %s166_s16 = scalar_lea.vmem %s664_s0, %s452_s13  ;;  %v175_v6 = vld [vmem:[%s665_s1] sm:$0xff]  ;;  %v176_v10 = vld [vmem:[%s665_s1 + $0x8] sm:$0xff]  ;;  %v177_v14 = vld [vmem:[%s665_s1 + $0x10] sm:$0xff]  ;;  %s621_s28 = scalar_lea.vmem %s666_s2, %s453_s25 }
   0xf   : > { %v194_v0 = vld [vmem:[%s166_s16 + $0x18] sm:$0xff]  ;;  %v193_v1 = vld [vmem:[%s166_s16 + $0x10] sm:$0xff]  ;;  %v192_v2 = vld [vmem:[%s166_s16 + $0x8] sm:$0xff] }
  0x10   : > { %455 = vmatpush.msra.mxu2 %v194_v0  ;;  %456 = vmatpush.msra.mxu3 %v194_v0  ;;  %v191_v3 = vld [vmem:[%s166_s16] sm:$0xff]  ;;  %v180_v11 = vld [vmem:[%s665_s1 + $0x28] sm:$0xff]  ;;  %v181_v15 = vld [vmem:[%s665_s1 + $0x30] sm:$0xff] }
  0x11   : > { %256 = vmatpush.msra.mxu0 %v194_v0  ;;  %454 = vmatpush.msra.mxu1 %v194_v0  ;;  %v179_v7 = vld [vmem:[%s665_s1 + $0x20] sm:$0xff]  ;;  %v186_v16 = vld [vmem:[%s665_s1 + $0x58] sm:$0xff] }
  0x12   : > { %458 = vmatpush.msra.mxu2 %v193_v1  ;;  %459 = vmatpush.msra.mxu3 %v193_v1  ;;  %v190_v17 = vld [vmem:[%s665_s1 + $0x78] sm:$0xff] }
  0x13   : > { %257 = vmatpush.msra.mxu0 %v193_v1  ;;  %457 = vmatpush.msra.mxu1 %v193_v1  ;;  %v178_v18 = vld [vmem:[%s665_s1 + $0x18] sm:$0xff] }
  0x14   : > { %461 = vmatpush.msra.mxu2 %v192_v2  ;;  %462 = vmatpush.msra.mxu3 %v192_v2  ;;  %v182_v19 = vld [vmem:[%s665_s1 + $0x38] sm:$0xff] }
  0x15   : > { %258 = vmatpush.msra.mxu0 %v192_v2  ;;  %460 = vmatpush.msra.mxu1 %v192_v2 }
  0x16   : > { %464 = vmatpush.msra.mxu2 %v191_v3  ;;  %465 = vmatpush.msra.mxu3 %v191_v3 }
  0x17   : > { %442 = vmatmul.msk.f32.vlgmr.msra.gmra.mxu2 %vm195_vm0, %v183_v4  ;;  %446 = vmatmul.msk.f32.vlgmr.msra.gmra.mxu3 %vm195_vm0, %v187_v5 }
  0x18   : > { %259 = vmatpush.msra.mxu0 %v191_v3  ;;  %463 = vmatpush.msra.mxu1 %v191_v3 }
  0x19   : > { %434 = vmatmul.msk.f32.vlgmr.msra.gmra.mxu0 %vm195_vm0, %v175_v6  ;;  %438 = vmatmul.msk.f32.vlgmr.msra.gmra.mxu1 %vm195_vm0, %v179_v7 }
  0x1f   : > { %443 = vmatmul.msk.f32.gmra.mxu2 %vm195_vm0, %v184_v8  ;;  %447 = vmatmul.msk.f32.gmra.mxu3 %vm195_vm0, %v188_v9 }
  0x21   : > { %435 = vmatmul.msk.f32.gmra.mxu0 %vm195_vm0, %v176_v10  ;;  %439 = vmatmul.msk.f32.gmra.mxu1 %vm195_vm0, %v180_v11 }
  0x27   : > { %444 = vmatmul.msk.f32.gmra.mxu2 %vm195_vm0, %v185_v12  ;;  %448 = vmatmul.msk.f32.gmra.mxu3 %vm195_vm0, %v189_v13 }
  0x29   : > { %436 = vmatmul.msk.f32.gmra.mxu0 %vm195_vm0, %v177_v14  ;;  %440 = vmatmul.msk.f32.gmra.mxu1 %vm195_vm0, %v181_v15 }
  0x2f   : > { %445 = vmatmul.msk.f32.gmra.mxu2 %vm195_vm0, %v186_v16  ;;  %449 = vmatmul.msk.f32.gmra.mxu3 %vm195_vm0, %v190_v17 }
  0x31   : > { %437 = vmatmul.msk.f32.gmra.mxu0 %vm195_vm0, %v178_v18  ;;  %441 = vmatmul.msk.f32.gmra.mxu1 %vm195_vm0, %v182_v19 }
  0x96   : > { %v261_v20 = vpop.f32.mrf.mxu0  ;;  %v273_v21 = vpop.f32.mrf.mxu1 }
  0x97   : > { %v309_v22 = vpack.c.bf16 %v261_v20, %v261_v20  ;;  %v313_v23 = vpack.c.bf16 %v273_v21, %v273_v21 }
  0x99   : > { %326 = vst.msk [vmem:[%s621_s28] sm:$0xf] %vm325_vm1, %v309_v22 }
  0x9a   : > { %330 = vst.msk [vmem:[%s621_s28 + $0x10] sm:$0xf] %vm325_vm1, %v313_v23  ;;  %v285_v24 = vpop.f32.mrf.mxu2  ;;  %v297_v25 = vpop.f32.mrf.mxu3 }
  0x9b   : > { %v317_v26 = vpack.c.bf16 %v285_v24, %v285_v24  ;;  %v321_v27 = vpack.c.bf16 %v297_v25, %v297_v25 }
  0x9d   : > { %334 = vst.msk [vmem:[%s621_s28 + $0x20] sm:$0xf] %vm325_vm1, %v317_v26 }
  0x9e   : > { %338 = vst.msk [vmem:[%s621_s28 + $0x30] sm:$0xf] %vm325_vm1, %v321_v27  ;;  %v264_v28 = vpop.f32.mrf.mxu0  ;;  %v276_v29 = vpop.f32.mrf.mxu1 }
  0x9f   : > { %v310_v30 = vpack.c.bf16 %v264_v28, %v264_v28  ;;  %v314_v31 = vpack.c.bf16 %v276_v29, %v276_v29 }
  0xa1   : > { %327 = vst.msk [vmem:[%s621_s28 + $0x4] sm:$0xf] %vm325_vm1, %v310_v30 }
  0xa2   : > { %331 = vst.msk [vmem:[%s621_s28 + $0x14] sm:$0xf] %vm325_vm1, %v314_v31  ;;  %v288_v32 = vpop.f32.mrf.mxu2  ;;  %v300_v33 = vpop.f32.mrf.mxu3 }
  0xa3   : > { %v318_v34 = vpack.c.bf16 %v288_v32, %v288_v32  ;;  %v322_v35 = vpack.c.bf16 %v300_v33, %v300_v33 }
  0xa5   : > { %335 = vst.msk [vmem:[%s621_s28 + $0x24] sm:$0xf] %vm325_vm1, %v318_v34 }
  0xa6   : > { %339 = vst.msk [vmem:[%s621_s28 + $0x34] sm:$0xf] %vm325_vm1, %v322_v35  ;;  %v267_v36 = vpop.f32.mrf.mxu0  ;;  %v279_v37 = vpop.f32.mrf.mxu1 }
  0xa7   : > { %v311_v38 = vpack.c.bf16 %v267_v36, %v267_v36  ;;  %v315_v39 = vpack.c.bf16 %v279_v37, %v279_v37 }
  0xa9   : > { %328 = vst.msk [vmem:[%s621_s28 + $0x8] sm:$0xf] %vm325_vm1, %v311_v38 }
  0xaa   : > { %332 = vst.msk [vmem:[%s621_s28 + $0x18] sm:$0xf] %vm325_vm1, %v315_v39  ;;  %v291_v40 = vpop.f32.mrf.mxu2  ;;  %v303_v41 = vpop.f32.mrf.mxu3 }
  0xab   : > { %v319_v42 = vpack.c.bf16 %v291_v40, %v291_v40  ;;  %v323_v43 = vpack.c.bf16 %v303_v41, %v303_v41 }
  0xad   : > { %336 = vst.msk [vmem:[%s621_s28 + $0x28] sm:$0xf] %vm325_vm1, %v319_v42 }
  0xae   : > { %340 = vst.msk [vmem:[%s621_s28 + $0x38] sm:$0xf] %vm325_vm1, %v323_v43  ;;  %v270_v44 = vpop.f32.mrf.mxu0  ;;  %v282_v45 = vpop.f32.mrf.mxu1 }
  0xaf   : > { %v312_v46 = vpack.c.bf16 %v270_v44, %v270_v44  ;;  %v316_v47 = vpack.c.bf16 %v282_v45, %v282_v45 }
  0xb1   : > { %329 = vst.msk [vmem:[%s621_s28 + $0xc] sm:$0xf] %vm325_vm1, %v312_v46 }
  0xb2   : > { %333 = vst.msk [vmem:[%s621_s28 + $0x1c] sm:$0xf] %vm325_vm1, %v316_v47  ;;  %v294_v48 = vpop.f32.mrf.mxu2  ;;  %v306_v49 = vpop.f32.mrf.mxu3 }
  0xb3   : > { %v320_v50 = vpack.c.bf16 %v294_v48, %v294_v48  ;;  %v324_v51 = vpack.c.bf16 %v306_v49, %v306_v49 }
  0xb5   : > { %337 = vst.msk [vmem:[%s621_s28 + $0x2c] sm:$0xf] %vm325_vm1, %v320_v50 }
  0xb6   : > { %341 = vst.msk [vmem:[%s621_s28 + $0x3c] sm:$0xf] %vm325_vm1, %v324_v51 }
  0xb7 PF: > { %s12_s11 = sadd.s32 1, %s512_s11   ;;  %s667_s9 = smov %s508_s10 }
  0xb8   : > { %p9_p5 = scmp.ge.s32.totalorder %s12_s11, 4   ;;  %s668_s10 = smov %s670_s12 }
  0xba   :  { %11 = sbr.rel (!%p9_p5) target bundleno = 2 (0x2), region = 58 }

// kernel: transposed_conv_layer.5
= control target key start
LH: loop header
LB: loop body
LE: loop exit
PB: predicated region body
PF: predicated region fallthrough
CT: control target
= control target key end

     0   :  { %s508_s12 = smov 0   ;;  %s510_s13 = smov 0   ;;  %s547_s0 = inlined_call_operand.vmem [shape: f32[2,16,512], index: 0, kind: input, shape index: {}, may-alias: {0,3}]   ;;  %s548_s1 = inlined_call_operand.vmem [shape: f32[2,16,1], index: 1, kind: input, shape index: {}]   ;;  %s549_s2 = inlined_call_operand.vmem [shape: f32[2,16,1], index: 2, kind: input, shape index: {}]   ;;  %s550_s3 = inlined_call_operand.vmem [shape: f32[2,16,512], index: 3, kind: output, shape index: {}, may-alias: {0,3}]  }
   0x1   :  { %s512_s14 = smov 0  }
   0x2 LB: > { %s25_s15 = sadd.s32 1, %s481_s13  ;;  %p421_p0 = scmp.ge.s32.totalorder %s485_s14, 1  ;;  %s485_s14 = sphi %s512_s14, %s13_s14   ;;  %s481_s13 = sphi %s510_s13, %s552_s13   ;;  %s477_s12 = sphi %s508_s12, %s551_s12  }
   0x3   : > { %p27_p1 = scmp.ge.s32.totalorder %s25_s15, 2  ;;  %p178_p2 = scmp.lt.s32.totalorder %s485_s14, 3 }
   0x5   : > { %s554_s15 = smov (%p27_p1, %s25_s15), 0  ;;  %p179_p3 = pnand %p421_p0, %p178_p2 }
   0x6   : > { %p221_p4 = scmp.lt.s32.totalorder (!%p179_p3), %s477_s12, 1 }
   0x7   : > { %182 = sbr.rel (%p179_p3) target bundleno = 148 (0x94), region = 32 }
   0xc   : > { %v487_v0 = vmov 0   ;;  %s556_s12 = smov (!%p221_p4, %s477_s12), 1 }
   0xd   : > { %462 = vset.pattern.permute.xlu1 %v487_v0  ;;  %461 = vset.pattern.permute.xlu0 %v487_v0  ;;  %s433_s16 = sshll.u32 %s556_s12, 4  ;;  %s432_s23 = sshll.u32 %s556_s12, 6 }
   0xe   : > { %s239_s19 = scalar_lea.vmem %s549_s2, %s433_s16  ;;  %s234_s22 = scalar_lea.vmem %s548_s1, %s433_s16 }
   0xf   : > { %v278_v1 = vld [vmem:[%s239_s19] sm:$0xff]  ;;  %v279_v3 = vld [vmem:[%s239_s19 + $0x8] sm:$0xff]  ;;  %s228_s26 = scalar_lea.vmem %s547_s0, %s432_s23  ;;  %s248_s29 = scalar_lea.vmem %s550_s3, %s432_s23 }
  0x10   : > { %282 = vperm.xlu1 %462, %v278_v1   ;;  %v258_v2 = vld [vmem:[%s234_s22] sm:$0xff]  ;;  %v259_v4 = vld [vmem:[%s234_s22 + $0x8] sm:$0xff]  ;;  %v252_v7 = vld [vmem:[%s228_s26 + $0x10] sm:$0xff] }
  0x11   : > { %262 = vperm.xlu0 %461, %v258_v2   ;;  %v250_v5 = vld [vmem:[%s228_s26] sm:$0xff]  ;;  %v251_v6 = vld [vmem:[%s228_s26 + $0x8] sm:$0xff]  ;;  %v253_v8 = vld [vmem:[%s228_s26 + $0x18] sm:$0xff] }
  0x12   : > { %v254_v11 = vld [vmem:[%s228_s26 + $0x20] sm:$0xff]  ;;  %v255_v16 = vld [vmem:[%s228_s26 + $0x28] sm:$0xff]  ;;  %v256_v17 = vld [vmem:[%s228_s26 + $0x30] sm:$0xff] }
  0x13   : > { %v257_v18 = vld [vmem:[%s228_s26 + $0x38] sm:$0xff] }
  0x18   : > { %287 = vperm.xlu1 %462, %v279_v3  }
  0x19   : > { %267 = vperm.xlu0 %461, %v259_v4  }
  0x82   : > { %v283_v9 = vpop.permute.xlu1 %282 }
  0x83   : > { %v263_v10 = vpop.permute.xlu0 %262 }
  0x84   : > { %v270_v12 = vmul.f32 %v263_v10, %v250_v5  ;;  %v271_v13 = vmul.f32 %v263_v10, %v251_v6  ;;  %v272_v14 = vmul.f32 %v263_v10, %v252_v7  ;;  %v273_v15 = vmul.f32 %v263_v10, %v253_v8 }
  0x86   : > { %v290_v19 = vadd.f32 %v283_v9, %v270_v12  ;;  %v291_v20 = vadd.f32 %v283_v9, %v271_v13  ;;  %v292_v21 = vadd.f32 %v283_v9, %v272_v14  ;;  %v293_v22 = vadd.f32 %v283_v9, %v273_v15 }
  0x88   : > { %298 = vst [vmem:[%s248_s29] sm:$0xff] %v290_v19 }
  0x89   : > { %299 = vst [vmem:[%s248_s29 + $0x8] sm:$0xff] %v291_v20 }
  0x8a   : > { %300 = vst [vmem:[%s248_s29 + $0x10] sm:$0xff] %v292_v21  ;;  %v288_v28 = vpop.permute.xlu1 %287 }
  0x8b   : > { %301 = vst [vmem:[%s248_s29 + $0x18] sm:$0xff] %v293_v22  ;;  %v268_v23 = vpop.permute.xlu0 %267 }
  0x8c   : > { %v274_v24 = vmul.f32 %v268_v23, %v254_v11  ;;  %v275_v25 = vmul.f32 %v268_v23, %v255_v16  ;;  %v276_v26 = vmul.f32 %v268_v23, %v256_v17  ;;  %v277_v27 = vmul.f32 %v268_v23, %v257_v18 }
  0x8e   : > { %v294_v29 = vadd.f32 %v288_v28, %v274_v24  ;;  %v295_v30 = vadd.f32 %v288_v28, %v275_v25  ;;  %v296_v31 = vadd.f32 %v288_v28, %v276_v26  ;;  %v297_v32 = vadd.f32 %v288_v28, %v277_v27 }
  0x90   : > { %302 = vst [vmem:[%s248_s29 + $0x20] sm:$0xff] %v294_v29 }
  0x91   : > { %303 = vst [vmem:[%s248_s29 + $0x28] sm:$0xff] %v295_v30 }
  0x92   : > { %304 = vst [vmem:[%s248_s29 + $0x30] sm:$0xff] %v296_v31 }
  0x93   : > { %305 = vst [vmem:[%s248_s29 + $0x38] sm:$0xff] %v297_v32 }
  0x94 PF: > { %s13_s14 = sadd.s32 1, %s485_s14   ;;  %s551_s12 = smov %s481_s13 }
  0x95   : > { %p10_p5 = scmp.ge.s32.totalorder %s13_s14, 4   ;;  %s552_s13 = smov %s554_s15 }
  0x97   :  { %12 = sbr.rel (!%p10_p5) target bundleno = 2 (0x2), region = 68 }

// kernel: transposed_conv_layer.4
= control target key start
LH: loop header
LB: loop body
LE: loop exit
PB: predicated region body
PF: predicated region fallthrough
CT: control target
= control target key end

     0   :  { %s964_s21 = smov 0   ;;  %s966_s22 = smov 0   ;;  %s1069_s0 = inlined_call_operand.vmem [shape: bf16[2,16,512], index: 0, kind: input, shape index: {}]   ;;  %s1070_s1 = inlined_call_operand.vmem [shape: f32[2,16,512], index: 1, kind: input, shape index: {}]   ;;  %s1071_s2 = inlined_call_operand.vmem [shape: f32[16,16], index: 2, kind: input, shape index: {}]   ;;  %s1072_s3 = inlined_call_operand.vmem [shape: f32[16,1], index: 3, kind: input, shape index: {}]   ;;  %s1073_s4 = inlined_call_operand.vmem [shape: f32[2,16,512], index: 4, kind: output, shape index: {0}]   ;;  %s1074_s5 = inlined_call_operand.vmem [shape: f32[2,1,8,128], index: 5, kind: output, shape index: {1}]   ;;  %s1075_s6 = inlined_call_operand.vmem [shape: f32[2,1,8,128], index: 6, kind: output, shape index: {2}]  }
   0x1   :  { %s968_s23 = smov 0  }
   0x2 LB: > { %s29_s24 = sadd.s32 1, %s921_s22  ;;  %p843_p0 = scmp.ge.s32.totalorder %s925_s23, 1  ;;  %s925_s23 = sphi %s968_s23, %s17_s23   ;;  %s921_s22 = sphi %s966_s22, %s1077_s22   ;;  %s917_s21 = sphi %s964_s21, %s1076_s21  }
   0x3   : > { %p31_p1 = scmp.ge.s32.totalorder %s29_s24, 2  ;;  %p259_p2 = scmp.lt.s32.totalorder %s925_s23, 3 }
   0x5   : > { %s1079_s24 = smov (%p31_p1, %s29_s24), 0  ;;  %p260_p3 = pnand %p843_p0, %p259_p2 }
   0x6   : > { %p321_p4 = scmp.lt.s32.totalorder (!%p260_p3), %s917_s21, 1 }
   0x7   : > { %263 = sbr.rel (%p260_p3) target bundleno = 551 (0x227), region = 36 }
   0xc   : > { %vm544_vm0 = vcmask 1040384   ;;  %v927_v0 = vmov 0.0   ;;  %v494_v2 = vld [vmem:[%s1072_s3 + $0x8] sm:$0xff]  ;;  %s1081_s21 = smov (!%p321_p4, %s917_s21), 1  ;;  %v928_v4 = vmov 0   ;;  %v376_v6 = vld [vmem:[%s1071_s2] sm:$0xff] }
   0xd   : > { %v545_v1 = vsel %vm544_vm0, 1.0, %v927_v0  ;;  %899 = vset.pattern.permute.xlu0 %v928_v4  ;;  %900 = vset.pattern.permute.xlu1 %v928_v4  ;;  %s863_s27 = sshll.u32 %s1081_s21, 6  ;;  %vm386_vm1 = vcmask 130048   ;;  %v377_v16 = vld [vmem:[%s1071_s2 + $0x8] sm:$0xff]  ;;  %v493_v17 = vld [vmem:[%s1072_s3] sm:$0xff]  ;;  %s862_s13 = sshll.u32 %s1081_s21, 5 }
   0xe   : > { %v547_v3 = vadd.f32 %v545_v1, %v545_v1  ;;  %502 = vperm.xlu1 %900, %v494_v2   ;;  %s338_s30 = scalar_lea.vmem %s1070_s1, %s863_s27  ;;  %s328_s16 = scalar_lea.vmem %s1069_s0, %s862_s13 }
   0xf   : > { %v384_v7 = vld [vmem:[%s338_s30 + $0x30] sm:$0xff]  ;;  %v385_v8 = vld [vmem:[%s338_s30 + $0x38] sm:$0xff]  ;;  %v382_v12 = vld [vmem:[%s338_s30 + $0x20] sm:$0xff]  ;;  %s1019_s19 = scalar_lea.vmem %s1073_s4, %s863_s27  ;;  %s850_s26 = sshll.u32 %s1081_s21, 3 }
  0x10   : > { %v549_v5 = vadd.f32 %v547_v3, %v545_v1  ;;  %v380_v10 = vld [vmem:[%s338_s30 + $0x10] sm:$0xff]  ;;  %453 = vmatpush.msra.mxu2 %v384_v7  ;;  %476 = vmatpush.msra.mxu3 %v385_v8  ;;  %v381_v11 = vld [vmem:[%s338_s30 + $0x18] sm:$0xff]  ;;  %v383_v13 = vld [vmem:[%s338_s30 + $0x28] sm:$0xff]  ;;  %s356_s29 = scalar_lea.vmem %s1074_s5, %s850_s26  ;;  %s363_s11 = scalar_lea.vmem %s1075_s6, %s850_s26 }
  0x11   : > { %407 = vmatpush.msra.mxu0 %v382_v12  ;;  %v378_v14 = vld [vmem:[%s338_s30] sm:$0xff]  ;;  %v379_v15 = vld [vmem:[%s338_s30 + $0x8] sm:$0xff]  ;;  %430 = vmatpush.msra.mxu1 %v383_v13  ;;  %v366_v34 = vld [vmem:[%s328_s16 + $0x10] sm:$0xff] }
  0x12   : > { %v551_v9 = vadd.f32 %v549_v5, %v545_v1  ;;  %454 = vmatpush.msra.mxu2 %v380_v10  ;;  %477 = vmatpush.msra.mxu3 %v381_v11  ;;  %v364_v25 = vld [vmem:[%s328_s16] sm:$0xff]  ;;  %v365_v27 = vld [vmem:[%s328_s16 + $0x8] sm:$0xff]  ;;  %v372_v40 = vunpack.c.l.bf16 %v366_v34  ;;  %v373_v44 = vunpack.c.h.bf16 %v366_v34  ;;  %v367_v45 = vld [vmem:[%s328_s16 + $0x18] sm:$0xff] }
  0x13   : > { %856 = vmatmul.msk.f32.vlgmr.msra.gmra.mxu2 %vm386_vm1, %v376_v6  ;;  %858 = vmatmul.msk.f32.vlgmr.msra.gmra.mxu3 %vm386_vm1, %v376_v6  ;;  %v369_v26 = vunpack.c.h.bf16 %v364_v25  ;;  %v368_v28 = vunpack.c.l.bf16 %v364_v25  ;;  %v370_v31 = vunpack.c.l.bf16 %v365_v27  ;;  %v371_v33 = vunpack.c.h.bf16 %v365_v27 }
  0x14   : > { %552 = vadd.xlane.f32.xlu0 %v551_v9  ;;  %408 = vmatpush.msra.mxu0 %v378_v14  ;;  %v374_v53 = vunpack.c.l.bf16 %v367_v45  ;;  %v375_v56 = vunpack.c.h.bf16 %v367_v45 }
  0x15   : > { %431 = vmatpush.msra.mxu1 %v379_v15  ;;  %852 = vmatmul.msk.f32.vlgmr.msra.gmra.mxu0 %vm386_vm1, %v376_v6 }
  0x16   : > { %854 = vmatmul.msk.f32.vlgmr.msra.gmra.mxu1 %vm386_vm1, %v376_v6 }
  0x1b   : > { %857 = vmatmul.msk.f32.gmra.mxu2 %vm386_vm1, %v377_v16  ;;  %859 = vmatmul.msk.f32.gmra.mxu3 %vm386_vm1, %v377_v16 }
  0x1d   : > { %853 = vmatmul.msk.f32.gmra.mxu0 %vm386_vm1, %v377_v16 }
  0x1e   : > { %855 = vmatmul.msk.f32.gmra.mxu1 %vm386_vm1, %v377_v16 }
  0x28   : > { %497 = vperm.xlu0 %899, %v493_v17  }
  0x80   : > { %v503_v50 = vpop.permute.xlu1 %502 }
  0x87   : > { %v553_v18 = vpop.xlane.xlu0 %552 }
  0x88   : > { %v554_v19 = vrot.slane %v553_v18, 4 }
  0x8a   : > { %v555_v20 = vadd.f32 %v554_v19, %v553_v18 }
  0x8c   : > { %v556_v21 = vrot.slane %v555_v20, 2 }
  0x8e   : > { %v557_v22 = vadd.f32 %v556_v21, %v555_v20 }
  0x90   : > { %v558_v23 = vrot.slane %v557_v22, 1 }
  0x92   : > { %v559_v24 = vadd.f32 %v558_v23, %v557_v22  ;;  %v410_v29 = vpop.f32.mrf.mxu0 }
  0x93   : > { %v433_v30 = vpop.f32.mrf.mxu1  ;;  %v485_v35 = vadd.f32 %v410_v29, %v368_v28 }
  0x94   : > { %865 = vpush %v559_v24  ;;  %v486_v32 = vadd.f32 %v433_v30, %v369_v26 }
  0x96   : > { %v456_v36 = vpop.f32.mrf.mxu2  ;;  %v479_v38 = vpop.f32.mrf.mxu3 }
  0x97   : > { %v487_v37 = vadd.f32 %v456_v36, %v370_v31  ;;  %v488_v41 = vadd.f32 %v479_v38, %v371_v33 }
  0x9a   : > { %v498_v39 = vpop.permute.xlu0 %497  ;;  %v413_v49 = vpop.f32.mrf.mxu0 }
  0x9b   : > { %v1021_v42 = vadd.f32 %v498_v39, %v485_v35  ;;  %v1023_v43 = vadd.f32 %v498_v39, %v486_v32  ;;  %v1025_v46 = vadd.f32 %v498_v39, %v487_v37  ;;  %v1027_v47 = vadd.f32 %v498_v39, %v488_v41  ;;  %v436_v52 = vpop.f32.mrf.mxu1 }
  0x9c   : > { %v489_v51 = vadd.f32 %v413_v49, %v372_v40  ;;  %v490_v55 = vadd.f32 %v436_v52, %v373_v44 }
  0x9d   : > { %513 = vst [vmem:[%s1019_s19] sm:$0xff] %v1021_v42  ;;  %v574_v48 = vadd.f32 %v1023_v43, %v1021_v42 }
  0x9e   : > { %514 = vst [vmem:[%s1019_s19 + $0x8] sm:$0xff] %v1023_v43  ;;  %v509_v57 = vadd.f32 %v503_v50, %v489_v51  ;;  %v510_v59 = vadd.f32 %v503_v50, %v490_v55  ;;  %v459_v60 = vpop.f32.mrf.mxu2  ;;  %v482_v62 = vpop.f32.mrf.mxu3 }
  0x9f   : > { %515 = vst [vmem:[%s1019_s19 + $0x10] sm:$0xff] %v1025_v46  ;;  %v575_v54 = vadd.f32 %v574_v48, %v1025_v46  ;;  %v491_v61 = vadd.f32 %v459_v60, %v374_v53  ;;  %v492_v63 = vadd.f32 %v482_v62, %v375_v56 }
  0xa0   : > { %516 = vst [vmem:[%s1019_s19 + $0x18] sm:$0xff] %v1027_v47 }
  0xa1   : > { %v576_v58 = vadd.f32 %v575_v54, %v1027_v47  ;;  %517 = vst [vmem:[%s1019_s19 + $0x20] sm:$0xff] %v509_v57  ;;  %v511_v1 = vadd.f32 %v503_v50, %v491_v61  ;;  %v512_v2 = vadd.f32 %v503_v50, %v492_v63 }
  0xa2   : > { %518 = vst [vmem:[%s1019_s19 + $0x28] sm:$0xff] %v510_v59 }
  0xa3   : > { %v577_v0 = vadd.f32 %v576_v58, %v509_v57  ;;  %519 = vst [vmem:[%s1019_s19 + $0x30] sm:$0xff] %v511_v1 }
  0xa4   : > { %520 = vst [vmem:[%s1019_s19 + $0x38] sm:$0xff] %v512_v2 }
  0xa5   : > { %v578_v3 = vadd.f32 %v577_v0, %v510_v59 }
  0xa7   : > { %v579_v4 = vadd.f32 %v578_v3, %v511_v1 }
  0xa9   : > { %v580_v5 = vadd.f32 %v579_v4, %v512_v2 }
  0xab   : > { %581 = vadd.xlane.f32.xlu1 %v580_v5 }
  0xc5   : > { %s866_s20 = spop %865 }
  0xc6   : > { %s561_s25 = smul.f32 16.0, %s866_s20 }
  0xc8   : > { %v590_v6 = vstv %s561_s25 }
  0xc9   : > { %901 = vrcp.f32 %v590_v6  ;;  %v602_v17 = vand.u32 2147483648, %v590_v6  ;;  %vm596_vm3 = vweird.f32 %v590_v6  ;;  %v600_v18 = vand.u32 2147483647, %v590_v6 }
  0xcb   : > { %v603_v22 = vor.u32 1.1754944e-38, %v602_v17  ;;  %vm601_vm5 = vcmp.eq.f32.partialorder %v600_v18, 8.507059e+37 }
  0xcf   : > { %v902_v7 = vpop.eup %901 }
  0xd0   : > { %v592_v8 = vmul.f32 %v902_v7, %v590_v6  ;;  %vm597_vm2 = vweird.f32 %v902_v7 }
  0xd1   : > { %vm598_vm4 = vmor %vm596_vm3, %vm597_vm2 }
  0xd2   : > { %v593_v9 = vsub.f32 1.0, %v592_v8 }
  0xd4   : > { %v594_v12 = vmul.f32 %v902_v7, %v593_v9 }
  0xd6   : > { %v595_v15 = vadd.f32 %v902_v7, %v594_v12 }
  0xd8   : > { %v599_v20 = vsel %vm598_vm4, %v902_v7, %v595_v15 }
  0xd9   : > { %v604_v23 = vsel %vm601_vm5, %v603_v22, %v599_v20 }
 0x11e   : > { %v582_v10 = vpop.xlane.xlu1 %581 }
 0x11f   : > { %v583_v11 = vrot.slane %v582_v10, 4 }
 0x121   : > { %v584_v13 = vadd.f32 %v583_v11, %v582_v10 }
 0x123   : > { %v585_v14 = vrot.slane %v584_v13, 2 }
 0x125   : > { %v586_v16 = vadd.f32 %v585_v14, %v584_v13 }
 0x127   : > { %v587_v19 = vrot.slane %v586_v16, 1 }
 0x129   : > { %v588_v21 = vadd.f32 %v587_v19, %v586_v16 }
 0x12b   : > { %867 = vpush %v588_v21 }
 0x12c   : > { %869 = vpush %v604_v23 }
 0x15c   : > { %s868_s30 = spop %867 }
 0x15d   : > { %v648_v24 = vstv %s868_s30  ;;  %s870_s7 = spop %869 }
 0x15e   : > { %649 = vst [vmem:[%s356_s29] sm:$0xff] %v648_v24  ;;  %s606_s8 = smul.f32 %s870_s7, %s868_s30 }
 0x160   : > { %v607_v25 = vstv %s606_s8 }
 0x161   : > { %v608_v26 = vsub.f32 %v1021_v42, %v607_v25  ;;  %v609_v27 = vsub.f32 %v1023_v43, %v607_v25  ;;  %v610_v28 = vsub.f32 %v1025_v46, %v607_v25  ;;  %v611_v29 = vsub.f32 %v1027_v47, %v607_v25 }
 0x162   : > { %v612_v32 = vsub.f32 %v509_v57, %v607_v25  ;;  %v613_v35 = vsub.f32 %v510_v59, %v607_v25  ;;  %v614_v38 = vsub.f32 %v511_v1, %v607_v25  ;;  %v615_v41 = vsub.f32 %v512_v2, %v607_v25 }
 0x163   : > { %v616_v30 = vmul.f32 %v608_v26, %v608_v26  ;;  %v617_v31 = vmul.f32 %v609_v27, %v609_v27  ;;  %v618_v33 = vmul.f32 %v610_v28, %v610_v28  ;;  %v619_v36 = vmul.f32 %v611_v29, %v611_v29 }
 0x164   : > { %v620_v39 = vmul.f32 %v612_v32, %v612_v32  ;;  %v621_v44 = vmul.f32 %v613_v35, %v613_v35  ;;  %v622_v43 = vmul.f32 %v614_v38, %v614_v38  ;;  %v623_v46 = vmul.f32 %v615_v41, %v615_v41 }
 0x165   : > { %v632_v34 = vadd.f32 %v617_v31, %v616_v30 }
 0x167   : > { %v633_v37 = vadd.f32 %v632_v34, %v618_v33 }
 0x169   : > { %v634_v40 = vadd.f32 %v633_v37, %v619_v36 }
 0x16b   : > { %v635_v42 = vadd.f32 %v634_v40, %v620_v39 }
 0x16d   : > { %v636_v45 = vadd.f32 %v635_v42, %v621_v44 }
 0x16f   : > { %v637_v48 = vadd.f32 %v636_v45, %v622_v43 }
 0x171   : > { %v638_v47 = vadd.f32 %v637_v48, %v623_v46 }
 0x173   : > { %639 = vadd.xlane.f32.xlu2 %v638_v47 }
 0x1e6   : > { %v640_v49 = vpop.xlane.xlu2 %639 }
 0x1e7   : > { %v641_v50 = vrot.slane %v640_v49, 4 }
 0x1e9   : > { %v642_v51 = vadd.f32 %v641_v50, %v640_v49 }
 0x1eb   : > { %v643_v52 = vrot.slane %v642_v51, 2 }
 0x1ed   : > { %v644_v53 = vadd.f32 %v643_v52, %v642_v51 }
 0x1ef   : > { %v645_v54 = vrot.slane %v644_v53, 1 }
 0x1f1   : > { %v646_v55 = vadd.f32 %v645_v54, %v644_v53 }
 0x1f3   : > { %871 = vpush %v646_v55 }
 0x224   : > { %s872_s12 = spop %871 }
 0x225   : > { %v650_v56 = vstv %s872_s12 }
 0x226   : > { %651 = vst [vmem:[%s363_s11] sm:$0xff] %v650_v56 }
 0x227 PF: > { %s17_s23 = sadd.s32 1, %s925_s23   ;;  %s1076_s21 = smov %s921_s22 }
 0x228   : > { %p14_p5 = scmp.ge.s32.totalorder %s17_s23, 4   ;;  %s1077_s22 = smov %s1079_s24 }
 0x22a   :  { %16 = sbr.rel (!%p14_p5) target bundleno = 2 (0x2), region = 93 }

</bundles_post_ra>
